<compile_context>
chip_gen: v7x
topology: tpu7x:2x2x1
jax: 0.10.0
libtpu: 0.0.40
codegen_flags: <defaults>
</compile_context>

<pallas_src>
import functools

import jax
import jax.numpy as jnp
from jax.experimental import pallas as pl
from jax.experimental.pallas import tpu as pltpu

# model_config stand-ins (model_config is not provided in the reference code).
LEAKY_RELU_SLOPE = 0.1
DISCRIMINATOR_PERIODS = [2, 3, 5]   # standard HiFi-GAN uses [2,3,5,7,11]; trimmed for a small demo

KERNEL_SIZE = 5
STRIDE = 3


def get_padding(kernel_size, dilation=1):
    return (kernel_size * dilation - dilation) // 2


def _round_up(x, m):
    return ((x + m - 1) // m) * m


# ---------------------------------------------------------------------------
# Pallas kernel: M/K-tiled matmul (bf16 operands, f32 accum) + bias + leaky-relu
# ---------------------------------------------------------------------------
def _matmul_bias_act_kernel(x_ref, w_ref, b_ref, o_ref, *, nk, apply_act, slope):
    k = pl.program_id(1)

    @pl.when(k == 0)
    def _():
        o_ref[...] = jnp.zeros_like(o_ref)

    # bf16 x bf16 -> f32 accumulation directly into the resident output block.
    o_ref[...] += jnp.dot(x_ref[...], w_ref[...], preferred_element_type=jnp.float32)

    @pl.when(k == nk - 1)
    def _():
        y = o_ref[...] + b_ref[...]              # (bm, Np) + (1, Np), all f32
        if apply_act:
            y = jnp.where(y >= 0, y, y * slope)  # F.leaky_relu (f32 epilogue)
        o_ref[...] = y


def _choose_bm(M):
    if M >= 4096:
        return 1024
    if M >= 1024:
        return 512
    return _round_up(M, 8)


def _choose_bk(Kp):
    # K values in this model: 16, 160, 640, 2560, 5120, 3072.
    if Kp > 512 and Kp % 512 == 0:
        return 512
    return Kp  # single K block (equal to full array dim -> always legal)


_MATMUL_CACHE = {}


def _get_matmul_fn(Mp, Kp, Np, bm, bk, apply_act):
    key = (Mp, Kp, Np, bm, bk, apply_act)
    if key in _MATMUL_CACHE:
        return _MATMUL_CACHE[key]

    nm = Mp // bm
    nk = Kp // bk

    kernel = functools.partial(
        _matmul_bias_act_kernel, nk=nk, apply_act=apply_act, slope=LEAKY_RELU_SLOPE
    )
    fn = pl.pallas_call(
        kernel,
        out_shape=jax.ShapeDtypeStruct((Mp, Np), jnp.float32),
        grid_spec=pltpu.PrefetchScalarGridSpec(
            num_scalar_prefetch=0,
            grid=(nm, nk),
            in_specs=[
                pl.BlockSpec((bm, bk), lambda m, k: (m, k)),   # X (bf16)
                pl.BlockSpec((bk, Np), lambda m, k: (k, 0)),   # W (bf16), nn == 1
                pl.BlockSpec((1, Np), lambda m, k: (0, 0)),    # bias (f32)
            ],
            out_specs=pl.BlockSpec((bm, Np), lambda m, k: (m, 0)),
        ),
        compiler_params=pltpu.CompilerParams(
            dimension_semantics=("parallel", "arbitrary"),
            vmem_limit_bytes=48 * 1024 * 1024,   # fits v5e/v6e/v7x budgets
        ),
    )
    _MATMUL_CACHE[key] = fn
    return fn


def matmul_bias_act(x_col, w2, bias, apply_act):
    """x_col: (M, K) f32, w2: (Kp, Np) bf16 (pre-padded), bias: (1, Np) f32.

    Returns (M, Np) f32 (caller slices the valid N columns)."""
    M, K = x_col.shape
    Kp, Np = w2.shape

    bm = _choose_bm(M)
    Mp = _round_up(M, bm)
    bk = _choose_bk(Kp)

    x = x_col.astype(jnp.bfloat16)
    if Mp != M or Kp != K:
        x = jnp.pad(x, ((0, Mp - M), (0, Kp - K)))

    out = _get_matmul_fn(Mp, Kp, Np, bm, bk, apply_act)(x, w2, bias)
    return out[:M]


# ---------------------------------------------------------------------------
# Conv2d((Kh,1),(stride,1),padding=((Kh-1)//2,0)) on channel-last activations
# ---------------------------------------------------------------------------
def conv_khx1_cl(x, w2, bias, stride, Kh, n_out, apply_act):
    """x: (B, W, H, Cin) channel-last; w2: (Kp, Np) bf16; bias: (1, Np) f32.

    Returns (B, W, H_out, Cout) channel-last, f32."""
    B, W, H, Cin = x.shape
    pad = (Kh - 1) // 2

    xp = jnp.pad(x, ((0, 0), (0, 0), (pad, pad), (0, 0)))  # zero pad along H only
    Hp = H + 2 * pad
    H_out = (Hp - Kh) // stride + 1

    # im2col built with a single lane-axis concat (column order = kh*Cin + ci,
    # matching the (Kh, Cin, Cout) weight reshape). No transposes needed.
    slabs = [
        xp[:, :, kh: kh + stride * (H_out - 1) + 1: stride, :] for kh in range(Kh)
    ]
    x_col = jnp.concatenate(slabs, axis=-1).reshape(B * W * H_out, Kh * Cin)

    out_flat = matmul_bias_act(x_col, w2, bias, apply_act)  # (M, Np)
    out = out_flat[:, :n_out].reshape(B, W, H_out, n_out)   # channel-last for next layer
    return out


# ---------------------------------------------------------------------------
# OnePeriodDiscriminator / MultiPeriodDiscriminator forward
# ---------------------------------------------------------------------------
def one_period_forward(x, params, period):
    b, t = x.shape
    if t % period != 0:
        n_pad = period - t % period
        x = jnp.pad(x, ((0, 0), (0, n_pad)), mode="reflect")
        t = t + n_pad
    H = t // period
    # torch: x.view(b, 1, H, period) (NCHW). Channel-last equivalent (B, W=period, H, 1):
    x = jnp.transpose(x.reshape(b, H, period), (0, 2, 1))[..., None]

    fmap = []
    strides = [STRIDE, STRIDE, STRIDE, STRIDE, 1]
    for (w2, bi, Kh, n_out), s in zip(params["convs"], strides):
        x = conv_khx1_cl(x, w2, bi, s, Kh, n_out, apply_act=True)
        fmap.append(jnp.transpose(x, (0, 3, 2, 1)))  # emit fmap in NCHW
    w2, bi, Kh, n_out = params["post"]
    x = conv_khx1_cl(x, w2, bi, 1, Kh, n_out, apply_act=False)
    x_nchw = jnp.transpose(x, (0, 3, 2, 1))
    fmap.append(x_nchw)
    out = x_nchw.reshape(b, -1)  # torch.flatten(x, 1, -1)
    return out, fmap


def multi_period_forward(real, fake, all_params):
    B = real.shape[0]
    both = jnp.concatenate([real, fake], axis=0)  # one pass per period for real+fake
    real_results, fake_results, fmap_reals, fmap_fakes = [], [], [], []
    for period, params in zip(DISCRIMINATOR_PERIODS, all_params):
        res, fmaps = one_period_forward(both, params, period)
        real_results.append(res[:B])
        fake_results.append(res[B:])
        fmap_reals.append([f[:B] for f in fmaps])
        fmap_fakes.append([f[B:] for f in fmaps])
    return real_results, fake_results, fmap_reals, fmap_fakes


# ---------------------------------------------------------------------------
# Parameter init + one-time weight preparation
# (weight_norm at init is the identity reparam: g = ||v||, so effective
#  weight == v; we therefore initialize the effective weight directly.)
# ---------------------------------------------------------------------------
def _prepare_conv(weight, bias):
    """weight: (Cout, Cin, Kh, 1) f32, bias: (Cout,) f32 ->
       (w2 bf16 (Kp, Np), bias f32 (1, Np), Kh, Cout)  padded/cast once."""
    Cout, Cin, Kh, _ = weight.shape
    # column order kh*Cin + ci (matches the im2col concat above)
    w2 = jnp.transpose(weight[..., 0], (2, 1, 0)).reshape(Kh * Cin, Cout)
    K = Kh * Cin
    Kp = _round_up(K, 16)                      # bf16 sublane-friendly (only affects Cin=1 layer)
    Np = _round_up(Cout, 128) if Cout < 128 else Cout  # lane-dense N for tiny-Cout layers
    w2 = jnp.pad(w2, ((0, Kp - K), (0, Np - Cout))).astype(jnp.bfloat16)
    b2 = jnp.pad(bias, (0, Np - Cout)).reshape(1, Np).astype(jnp.float32)
    return (w2, b2, Kh, Cout)


def init_one_period(key):
    chans = [(1, 32), (32, 128), (128, 512), (512, 1024), (1024, 1024)]
    convs = []
    for cin, cout in chans:
        key, k1, k2 = jax.random.split(key, 3)
        fan_in = cin * KERNEL_SIZE
        w = jax.random.normal(k1, (cout, cin, KERNEL_SIZE, 1), jnp.float32) / jnp.sqrt(fan_in)
        b = jax.random.normal(k2, (cout,), jnp.float32) * 0.01
        convs.append(_prepare_conv(w, b))
    key, k1, k2 = jax.random.split(key, 3)
    wpost = jax.random.normal(k1, (1, 1024, 3, 1), jnp.float32) / jnp.sqrt(1024 * 3)
    bpost = jax.random.normal(k2, (1,), jnp.float32) * 0.01
    return {"convs": convs, "post": _prepare_conv(wpost, bpost)}


def init_mpd(key):
    params = []
    for _ in DISCRIMINATOR_PERIODS:
        key, sub = jax.random.split(key)
        params.append(init_one_period(sub))
    return params


if __name__ == "__main__":
    key = jax.random.PRNGKey(0)
    kp, kr, kf = jax.random.split(key, 3)

    all_params = init_mpd(kp)

    B, T = 2, 64  # small waveform: batch=2, seq=64
    real = jax.random.normal(kr, (B, T), jnp.float32)
    fake = jax.random.normal(kf, (B, T), jnp.float32)

    real_results, fake_results, fmap_reals, fmap_fakes = multi_period_forward(
        real, fake, all_params
    )

    # block on everything
    jax.block_until_ready(real_results)
    jax.block_until_ready(fake_results)
    jax.block_until_ready(fmap_reals)
    jax.block_until_ready(fmap_fakes)

    print("KERNEL_OK")
</pallas_src>

<mosaic_0001>
module attributes {stable_mosaic.version = 11 : i64} {
  func.func @_matmul_bias_act_kernel(%arg0: i32, %arg1: i32, %arg2: memref<88x16xbf16, #tpu.memory_space<vmem>>, %arg3: memref<16x128xbf16, #tpu.memory_space<vmem>>, %arg4: memref<1x128xf32, #tpu.memory_space<vmem>>, %arg5: memref<88x128xf32, #tpu.memory_space<vmem>>) attributes {dimension_semantics = [#tpu.dimension_semantics<parallel>, #tpu.dimension_semantics<arbitrary>], iteration_bounds = array<i64: 1, 1>, scalar_prefetch = 0 : i64, scratch_operands = 0 : i64, tpu.core_type = #tpu.core_type<tc>, window_params = [{transform_indices = @transform_0, window_bounds = array<i64: 88, 16>}, {transform_indices = @transform_1, window_bounds = array<i64: 16, 128>}, {pipeline_mode = #tpu.pipeline_mode<synchronous>, transform_indices = @transform_2, window_bounds = array<i64: 1, 128>}, {transform_indices = @transform_3, window_bounds = array<i64: 88, 128>}]} {
    %c0_i32 = arith.constant 0 : i32
    %0 = arith.cmpi eq, %arg1, %c0_i32 : i32
    %1 = arith.extui %0 : i1 to i32
    %c0_i32_0 = arith.constant 0 : i32
    %2 = arith.cmpi ne, %1, %c0_i32_0 : i32
    scf.if %2 {
      %cst_10 = arith.constant 0.000000e+00 : f32
      %12 = vector.broadcast %cst_10 : f32 to vector<88x128xf32>
      %c0_11 = arith.constant 0 : index
      %c0_12 = arith.constant 0 : index
      %13 = vector.load %arg5[%c0_11, %c0_12] : memref<88x128xf32, #tpu.memory_space<vmem>>, vector<88x128xf32>
      tpu.vector_store %arg5[%c0_11, %c0_12], %12 {strides = array<i32>} : memref<88x128xf32, #tpu.memory_space<vmem>>, vector<88x128xf32>,
    } else {
    }
    %c0 = arith.constant 0 : index
    %c0_1 = arith.constant 0 : index
    %3 = vector.load %arg5[%c0, %c0_1] : memref<88x128xf32, #tpu.memory_space<vmem>>, vector<88x128xf32>
    %c0_2 = arith.constant 0 : index
    %c0_3 = arith.constant 0 : index
    %4 = vector.load %arg2[%c0_2, %c0_3] : memref<88x16xbf16, #tpu.memory_space<vmem>>, vector<88x16xbf16>
    %c0_4 = arith.constant 0 : index
    %c0_5 = arith.constant 0 : index
    %5 = vector.load %arg3[%c0_4, %c0_5] : memref<16x128xbf16, #tpu.memory_space<vmem>>, vector<16x128xbf16>
    %cst = arith.constant dense<0.000000e+00> : vector<88x128xf32>
    %6 = tpu.matmul %4, %5, %cst {dimension_numbers = #tpu.dot_dimension_numbers<[1], [0], [0], [1], [0, 0, 1, 1], [], []>} : vector<88x16xbf16>, vector<16x128xbf16>, vector<88x128xf32> -> vector<88x128xf32>
    %7 = arith.addf %3, %6 : vector<88x128xf32>
    %c0_6 = arith.constant 0 : index
    %c0_7 = arith.constant 0 : index
    %8 = vector.load %arg5[%c0_6, %c0_7] : memref<88x128xf32, #tpu.memory_space<vmem>>, vector<88x128xf32>
    tpu.vector_store %arg5[%c0_6, %c0_7], %7 {strides = array<i32>} : memref<88x128xf32, #tpu.memory_space<vmem>>, vector<88x128xf32>,
    %c0_i32_8 = arith.constant 0 : i32
    %9 = arith.cmpi eq, %arg1, %c0_i32_8 : i32
    %10 = arith.extui %9 : i1 to i32
    %c0_i32_9 = arith.constant 0 : i32
    %11 = arith.cmpi ne, %10, %c0_i32_9 : i32
    scf.if %11 {
      %c0_10 = arith.constant 0 : index
      %c0_11 = arith.constant 0 : index
      %12 = vector.load %arg5[%c0_10, %c0_11] : memref<88x128xf32, #tpu.memory_space<vmem>>, vector<88x128xf32>
      %c0_12 = arith.constant 0 : index
      %c0_13 = arith.constant 0 : index
      %13 = vector.load %arg4[%c0_12, %c0_13] : memref<1x128xf32, #tpu.memory_space<vmem>>, vector<1x128xf32>
      %14 = vector.broadcast %13 : vector<1x128xf32> to vector<88x128xf32>
      %15 = arith.addf %12, %14 : vector<88x128xf32>
      %cst_14 = arith.constant 0.000000e+00 : f32
      %16 = vector.broadcast %cst_14 : f32 to vector<88x128xf32>
      %17 = arith.cmpf oge, %15, %16 : vector<88x128xf32>
      %cst_15 = arith.constant 1.000000e-01 : f32
      %18 = vector.broadcast %cst_15 : f32 to vector<88x128xf32>
      %19 = arith.mulf %15, %18 : vector<88x128xf32>
      %20 = arith.select %17, %15, %19 : vector<88x128xi1>, vector<88x128xf32>
      %c0_16 = arith.constant 0 : index
      %c0_17 = arith.constant 0 : index
      %21 = vector.load %arg5[%c0_16, %c0_17] : memref<88x128xf32, #tpu.memory_space<vmem>>, vector<88x128xf32>
      tpu.vector_store %arg5[%c0_16, %c0_17], %20 {strides = array<i32>} : memref<88x128xf32, #tpu.memory_space<vmem>>, vector<88x128xf32>,
    } else {
    }
    return
  }
  func.func @transform_0(%arg0: i32, %arg1: i32) -> (i32, i32) {
    %c0_i32 = arith.constant 0 : i32
    return %arg0, %arg1 : i32, i32
  }
  func.func @transform_1(%arg0: i32, %arg1: i32) -> (i32, i32) {
    %c0_i32 = arith.constant 0 : i32
    %c0_i32_0 = arith.constant 0 : i32
    return %arg1, %c0_i32 : i32, i32
  }
  func.func @transform_2(%arg0: i32, %arg1: i32) -> (i32, i32) {
    %c0_i32 = arith.constant 0 : i32
    %c0_i32_0 = arith.constant 0 : i32
    %c0_i32_1 = arith.constant 0 : i32
    return %c0_i32, %c0_i32_0 : i32, i32
  }
  func.func @transform_3(%arg0: i32, %arg1: i32) -> (i32, i32) {
    %c0_i32 = arith.constant 0 : i32
    %c0_i32_0 = arith.constant 0 : i32
    return %arg0, %c0_i32 : i32, i32
  }
}

</mosaic_0001>

<bundles_post_ra>
// kernel: tpu_custom_call.1
= control target key start
LH: loop header
LB: loop body
LE: loop exit
PB: predicated region body
PF: predicated region fallthrough
CT: control target
= control target key end

     0   :  { %vm89_vm0 = vcmask 130048   ;;  %s439_s0 = inlined_call_operand.vmem [shape: bf16[88,16], index: 0, kind: input, shape index: {}]   ;;  %s440_s1 = inlined_call_operand.vmem [shape: bf16[16,128], index: 1, kind: input, shape index: {}]   ;;  %s441_s2 = inlined_call_operand.vmem [shape: f32[1,128], index: 2, kind: input, shape index: {}]   ;;  %s442_s3 = inlined_call_operand.hbm [shape: f32[88,128], index: 3, kind: output, shape index: {}]  }
   0x1   :  { %v343_v0 = vld [vmem:[%s440_s1] sm:$0xff]   ;;  %v344_v1 = vld [vmem:[%s439_s0 + $0x10] sm:$0xff]   ;;  %v345_v2 = vld [vmem:[%s439_s0 + $0x18] sm:$0xff]  }
   0x2   :  { %337 = vmatprep.subr.bf16.mxu1 %v343_v0  ;;  %323 = vmatprep.subr.bf16.mxu0 %v343_v0  ;;  %v346_v3 = vld [vmem:[%s439_s0] sm:$0xff]   ;;  %v347_v4 = vld [vmem:[%s439_s0 + $0x8] sm:$0xff]  }
   0x3   :  { %338 = vmatpush3.bf16.msra.mxu1 %v343_v0  ;;  %329 = vmatprep.mubr.msk.bf16.mxu1 %vm89_vm0, %v344_v1  ;;  %v348_v5 = vld [vmem:[%s439_s0 + $0x20] sm:$0xff]  }
   0x4   :  { %324 = vmatpush3.bf16.msra.mxu0 %v343_v0  ;;  %325 = vmatprep.mubr.msk.bf16.mxu0 %vm89_vm0, %v346_v3 }
   0x6   :  { %330 = vmatmul.mubr.msk.bf16.vlgmr.msra.gmra.mrb[0].mxu1 %vm89_vm0, %v345_v2 }
   0x7   :  { %8 = vsyncpa [#allocation3], 0  ;;  %326 = vmatmul.mubr.msk.bf16.vlgmr.msra.gmra.mrb[0].mxu0 %vm89_vm0, %v347_v4  ;;  %333 = vmatprep.mubr.msk.bf16.mxu1 %vm89_vm0, %v348_v5  ;;  %v349_v6 = vld [vmem:[%s439_s0 + $0x28] ss:$0 sps:$4 sm:$0xff]   ;;  %v315_v8 = vld [vmem:[%s441_s2] ss:$0 sm:$0xff] }
   0x8   :  { %s374_s0 = smov [#allocation2]  }
   0x9   :  { %s291_s2 = sshll.u32 %s374_s0, 4  ;;  %s292_s2 = int_to_ptr.vmem [resolvable:$true] %s291_s2 }
   0xa   :  { %s350_s27 = scalar_lea.vmem %s292_s2, 1408  ;;  %p355_p1 = scmp.lt.s32.totalorder %s292_s2, %s292_s2 }
   0xb   :  { %p351_p0 = scmp.ne.s32.totalorder %s292_s2, %s350_s27  ;;  %p356_p2 = scmp.lt.s32.totalorder %s350_s27, %s350_s27 }
   0xd   :  { %p357_p3 = por %p356_p2, %p355_p1 }
   0xe   :  { %334 = vmatmul.mubr.msk.bf16.gmra.mrb[4].mxu1 %vm89_vm0, %v349_v6 }
   0xf   :  { %p358_p4 = pnand %p357_p3, %p351_p0 }
  0xd9   :  { %v331_v7 = vpop.f32.mrb[0].mxu1 }
  0xda   :  { %v158_v9 = vpop.f32.mrb[1].mxu1  ;;  %v327_v10 = vpop.f32.mrb[0].mxu0  ;;  %v237_v13 = vadd.f32 %v331_v7, %v315_v8 }
  0xdb   :  { %v332_v11 = vpop.f32.mrb[2].mxu1  ;;  %v142_v12 = vpop.f32.mrb[1].mxu0  ;;  %v235_v16 = vadd.f32 %v315_v8, %v158_v9  ;;  %v233_v17 = vadd.f32 %v327_v10, %v315_v8 }
  0xdc   :  { %v161_v14 = vpop.f32.mrb[3].mxu1  ;;  %v328_v15 = vpop.f32.mrb[2].mxu0  ;;  %vm248_vm1 = vcmp.ge.f32.partialorder %v237_v13, 0.0  ;;  %v259_v19 = vmul.f32 0.1, %v237_v13  ;;  %v238_v20 = vadd.f32 %v332_v11, %v315_v8  ;;  %v231_v21 = vadd.f32 %v315_v8, %v142_v12 }
  0xdd   :  { %v145_v18 = vpop.f32.mrb[3].mxu0  ;;  %vm246_vm2 = vcmp.ge.f32.partialorder %v235_v16, 0.0  ;;  %v257_v22 = vmul.f32 0.1, %v235_v16  ;;  %vm244_vm3 = vcmp.ge.f32.partialorder %v233_v17, 0.0  ;;  %v236_v26 = vadd.f32 %v315_v8, %v161_v14 }
  0xde   :  { %v255_v23 = vmul.f32 0.1, %v233_v17  ;;  %v270_v24 = vsel %vm248_vm1, %v237_v13, %v259_v19  ;;  %vm249_vm4 = vcmp.ge.f32.partialorder %v238_v20, 0.0  ;;  %v260_v25 = vmul.f32 0.1, %v238_v20 }
  0xdf   :  { %281 = vst [vmem:[#allocation2 + $0x30] sm:$0xff] %v270_v24  ;;  %v268_v27 = vsel %vm246_vm2, %v235_v16, %v257_v22  ;;  %vm242_vm5 = vcmp.ge.f32.partialorder %v231_v21, 0.0  ;;  %v253_v29 = vmul.f32 0.1, %v231_v21  ;;  %vm247_vm6 = vcmp.ge.f32.partialorder %v236_v26, 0.0 }
  0xe0   :  { %v266_v28 = vsel %vm244_vm3, %v233_v17, %v255_v23  ;;  %279 = vst [vmem:[#allocation2 + $0x20] sm:$0xff] %v268_v27  ;;  %v271_v31 = vsel %vm249_vm4, %v238_v20, %v260_v25  ;;  %v258_v32 = vmul.f32 0.1, %v236_v26  ;;  %v234_v33 = vadd.f32 %v328_v15, %v315_v8 }
  0xe1   :  { %v335_v30 = vpop.f32.mrb[4].mxu1  ;;  %277 = vst [vmem:[#allocation2 + $0x10] sm:$0xff] %v266_v28  ;;  %282 = vst [vmem:[#allocation2 + $0x38] sm:$0xff] %v271_v31  ;;  %v264_v35 = vsel %vm242_vm5, %v231_v21, %v253_v29  ;;  %v232_v40 = vadd.f32 %v315_v8, %v145_v18 }
  0xe2   :  { %v174_v34 = vpop.f32.mrb[5].mxu1  ;;  %v269_v37 = vsel %vm247_vm6, %v236_v26, %v258_v32  ;;  %275 = vst [vmem:[#allocation2] sm:$0xff] %v264_v35  ;;  %vm245_vm7 = vcmp.ge.f32.partialorder %v234_v33, 0.0  ;;  %v256_v38 = vmul.f32 0.1, %v234_v33  ;;  %v241_v41 = vadd.f32 %v335_v30, %v315_v8 }
  0xe3   :  { %v336_v36 = vpop.f32.mrb[6].mxu1  ;;  %280 = vst [vmem:[#allocation2 + $0x28] sm:$0xff] %v269_v37  ;;  %v239_v42 = vadd.f32 %v315_v8, %v174_v34  ;;  %vm243_vm8 = vcmp.ge.f32.partialorder %v232_v40, 0.0  ;;  %v254_v44 = vmul.f32 0.1, %v232_v40 }
  0xe4   :  { %v177_v39 = vpop.f32.mrb[7].mxu1  ;;  %v267_v43 = vsel %vm245_vm7, %v234_v33, %v256_v38  ;;  %vm252_vm9 = vcmp.ge.f32.partialorder %v241_v41, 0.0  ;;  %v263_v45 = vmul.f32 0.1, %v241_v41 }
  0xe5   :  { %278 = vst [vmem:[#allocation2 + $0x18] sm:$0xff] %v267_v43  ;;  %vm250_vm10 = vcmp.ge.f32.partialorder %v239_v42, 0.0  ;;  %v261_v46 = vmul.f32 0.1, %v239_v42  ;;  %v240_v47 = vadd.f32 %v315_v8, %v177_v39  ;;  %v265_v48 = vsel %vm243_vm8, %v232_v40, %v254_v44 }
  0xe6   :  { %v274_v49 = vsel %vm252_vm9, %v241_v41, %v263_v45  ;;  %276 = vst [vmem:[#allocation2 + $0x8] sm:$0xff] %v265_v48 }
  0xe7   :  { %285 = vst [vmem:[#allocation2 + $0x50] sm:$0xff] %v274_v49  ;;  %v272_v50 = vsel %vm250_vm10, %v239_v42, %v261_v46  ;;  %vm251_vm11 = vcmp.ge.f32.partialorder %v240_v47, 0.0  ;;  %v262_v51 = vmul.f32 0.1, %v240_v47 }
  0xe8   :  { %283 = vst [vmem:[#allocation2 + $0x40] sm:$0xff] %v272_v50 }
  0xe9   :  { %v273_v52 = vsel %vm251_vm11, %v240_v47, %v262_v51 }
  0xea   :  { %284 = vst [vmem:[#allocation2 + $0x48] sm:$0xff] %v273_v52 }
  0xeb   :  { %361 = shalt.err (!%p358_p4)
}
  0xec   :  { %s362_s30 = scalar_lea.hbm %s442_s3, 1408 }
  0xed   :  { %p363_p5 = scmp.ne.s32.totalorder %s442_s3, %s362_s30  ;;  %p366_p6 = scmp.lt.u32.totalorder %s362_s30, %s442_s3 }
  0xef   :  { %p368_p7 = pnand %p366_p6, %p363_p5 }
  0xf1   :  { %371 = shalt.err (!%p368_p7)
}
  0xf2   :  { %s375_s8 = smov 128   ;;  %s376_s9 = smov 8  }
  0xf3   :  { %297 = dma.vmem_to_hbm [thread:$0]  %s292_s2, 1408, %s442_s3, [#allocation3], %s375_s8, %s375_s8, %s376_s9  }
  0xf4   :  { %372 = dma.done.wait [#allocation3], 1408  }
  0xf5   :  { %373 = vsyncadd [#allocation3], 4294965888 }
  0xf6   :  { %301 = vsyncpa [#allocation3], 1 }

</bundles_post_ra>
